<compile_context>
chip_gen: v7x
topology: tpu7x:2x2x1
jax: 0.10.0
libtpu: 0.0.40
codegen_flags: <defaults>
</compile_context>

<pallas_src>
import functools

import jax
import jax.numpy as jnp
from jax.experimental import pallas as pl
from jax.experimental.pallas import tpu as pltpu

_MIB = 1024 * 1024


def _round_up(x, m):
    return ((x + m - 1) // m) * m


def _vmem_capacity_bytes():
    """Best-effort physical VMEM capacity; conservative (v7x) fallback."""
    try:
        info = pltpu.get_tpu_info()
        cap = getattr(info, "vmem_capacity_bytes", None)
        if cap:
            return int(cap)
    except Exception:
        pass
    return 64 * _MIB


def _unembed_kernel(x_ref, w_ref, b_ref, o_ref):
    # One full-K MXU matmul per (M-tile, N-tile); f32 accumulation.
    acc = jnp.dot(x_ref[...], w_ref[...], preferred_element_type=jnp.float32)
    # b_ref is (1, tn) f32; broadcasts over the tm rows of the tile.
    o_ref[...] = (acc + b_ref[...]).astype(o_ref.dtype)


@functools.partial(
    jax.jit, static_argnames=("d_vocab", "tn", "out_dtype", "vmem_limit")
)
def _unembed_forward(residual, w2d, b2d, *, d_vocab, tn, out_dtype, vmem_limit):
    """residual: [batch, pos, d_model]; w2d: [d_model, N_pad] (pre-cast, pre-padded)."""
    batch, pos, d_model = residual.shape
    K, n_pad = w2d.shape
    assert d_model == K and n_pad % tn == 0
    M = batch * pos

    compute_dtype = w2d.dtype
    cbytes = jnp.dtype(compute_dtype).itemsize
    obytes = jnp.dtype(out_dtype).itemsize

    # ---- M-tile selection: 16-aligned (bf16 sublane pack), balanced so the
    # trailing tile is not nearly empty (wastes only MXU flops after the grid
    # swap, but cheap to avoid). ----
    tm_max = 256
    if M <= tm_max:
        tm = _round_up(M, 16)
    else:
        grid_m0 = -(-M // tm_max)                  # ceil(M / 256)
        tm = _round_up(-(-M // grid_m0), 16)       # balanced tile, 16-aligned
    m_pad = _round_up(M, tm)
    grid_m = m_pad // tm
    grid_n = n_pad // tn

    # Residual is small (M*K); cast/pad per call is negligible (unlike W_U).
    x2d = residual.reshape(M, K).astype(compute_dtype)
    if m_pad != M:
        x2d = jnp.pad(x2d, ((0, m_pad - M), (0, 0)))

    # Cost estimate matches the (vocab outer, rows inner) loop order.
    cost = pl.CostEstimate(
        flops=2 * M * K * n_pad,
        transcendentals=0,
        bytes_accessed=(
            K * n_pad * cbytes           # W_U streamed from HBM exactly once
            + grid_n * M * K * cbytes    # residual re-read once per vocab slab
            + n_pad * 4                  # bias
            + M * n_pad * obytes         # logits written
        ),
    )

    out2d = pl.pallas_call(
        _unembed_kernel,
        out_shape=jax.ShapeDtypeStruct((m_pad, n_pad), out_dtype),
        grid_spec=pltpu.PrefetchScalarGridSpec(
            num_scalar_prefetch=0,
            grid=(grid_n, grid_m),  # vocab OUTER, rows INNER
            in_specs=[
                pl.BlockSpec((tm, K), lambda j, i: (i, 0)),   # residual rows
                pl.BlockSpec((K, tn), lambda j, i: (0, j)),   # W_U slab (resident per j)
                pl.BlockSpec((1, tn), lambda j, i: (0, j)),   # bias slab (f32)
            ],
            out_specs=pl.BlockSpec((tm, tn), lambda j, i: (i, j)),
        ),
        compiler_params=pltpu.CompilerParams(
            dimension_semantics=("parallel", "parallel"),
            vmem_limit_bytes=vmem_limit,
        ),
        cost_estimate=cost,
    )(x2d, w2d, b2d)

    return out2d[:M, :d_vocab].reshape(batch, pos, d_vocab)


class UnembedPallas:
    """Pallas TPU Unembed: logits = residual @ W_U + b_U.

    Weight cast + vocab padding happen once here (hoisted out of the jitted
    per-call path). out_dtype=None -> logits in residual's dtype; pass
    jnp.bfloat16 to halve the logits write stream when the consumer allows.
    """

    def __init__(self, W_U, b_U, *, compute_dtype=jnp.bfloat16, out_dtype=None,
                 vmem_budget_bytes=None):
        d_model, d_vocab = W_U.shape
        assert b_U.shape == (d_vocab,)
        self.d_model, self.d_vocab = int(d_model), int(d_vocab)
        self.compute_dtype = jnp.dtype(compute_dtype)
        self.out_dtype = None if out_dtype is None else jnp.dtype(out_dtype)

        cbytes = self.compute_dtype.itemsize
        obytes = 4  # budget for worst-case f32 logits

        # ---- generation-aware VMEM budget ----
        vmem_cap = _vmem_capacity_bytes()
        big_vmem = vmem_cap >= 128 * _MIB
        if vmem_budget_bytes is None:
            vmem_budget_bytes = (96 * _MIB) if big_vmem else (40 * _MIB)
        limit_cap = (100 * _MIB) if big_vmem else (56 * _MIB)

        # ---- vocab-tile (tn) selection: lane-dense, multiple of 256 when
        # possible (v6e/v7x MXU pass width), full-K slabs. ----
        tm_ref = 256
        if cbytes <= 2:
            tn_cap = 2048 if big_vmem else 1024
        else:
            tn_cap = 1024 if big_vmem else 512
        tn = min(_round_up(self.d_vocab, 128), tn_cap)
        if tn >= 256:
            tn = (tn // 256) * 256

        def _need(tn_):
            return (2 * (tm_ref * self.d_model + self.d_model * tn_) * cbytes
                    + 2 * tm_ref * tn_ * obytes
                    + 2 * tn_ * 4)

        while tn > 256 and _need(tn) > vmem_budget_bytes:
            tn -= 256
        while tn > 128 and _need(tn) > vmem_budget_bytes:
            tn -= 128
        tn = max(tn, 128)
        self.tn = int(tn)
        self.vmem_limit = int(min(limit_cap, max(32 * _MIB, _need(tn) * 5 // 4)))

        # ---- one-time weight prep: cast + pad (hoisted out of forward) ----
        n_pad = _round_up(self.d_vocab, self.tn)
        w2d = jnp.asarray(W_U, dtype=self.compute_dtype)
        b2d = jnp.asarray(b_U, dtype=jnp.float32).reshape(1, self.d_vocab)
        if n_pad != self.d_vocab:
            w2d = jnp.pad(w2d, ((0, 0), (0, n_pad - self.d_vocab)))
            b2d = jnp.pad(b2d, ((0, 0), (0, n_pad - self.d_vocab)))
        self.w2d = jax.device_put(w2d)
        self.b2d = jax.device_put(b2d)

    def __call__(self, residual):
        out_dtype = residual.dtype if self.out_dtype is None else self.out_dtype
        return _unembed_forward(
            residual, self.w2d, self.b2d,
            d_vocab=self.d_vocab, tn=self.tn,
            out_dtype=out_dtype, vmem_limit=self.vmem_limit,
        )


if __name__ == "__main__":
    # Small config consistent with the module: batch=2, pos=8,
    # d_model=32, d_vocab_out=256.
    batch, pos, d_model, d_vocab_out = 2, 8, 32, 256

    key = jax.random.PRNGKey(0)
    k_res, k_w = jax.random.split(key)

    residual = jax.random.normal(k_res, (batch, pos, d_model), dtype=jnp.float32)
    # W_U is torch.empty in __init__ -> initialize deterministically here.
    W_U = jax.random.normal(k_w, (d_model, d_vocab_out), dtype=jnp.float32) * 0.02
    # b_U initialized to zeros, matching nn.Parameter(torch.zeros(...)).
    b_U = jnp.zeros((d_vocab_out,), dtype=jnp.float32)

    # Pure-JAX reference (batch_addmm semantics: residual @ W_U + b_U).
    ref = jnp.einsum("bpd,dv->bpv", residual, W_U) + b_U

    # Default bf16 compute path (f32 accumulation) — tolerance at bf16 level.
    unembed_bf16 = UnembedPallas(W_U, b_U)
    out = unembed_bf16(residual)
    jax.block_until_ready(out)
    assert out.shape == (batch, pos, d_vocab_out)
    assert jnp.allclose(out, ref, atol=2e-2, rtol=2e-2)

    # f32 compute path at tight tolerance.
    unembed_f32 = UnembedPallas(W_U, b_U, compute_dtype=jnp.float32)
    out_f32 = unembed_f32(residual)
    jax.block_until_ready(out_f32)
    assert jnp.allclose(out_f32, ref, atol=1e-5, rtol=1e-5)

    print("KERNEL_OK")
</pallas_src>

<mosaic_0001>
module attributes {stable_mosaic.version = 11 : i64} {
  func.func @_unembed_kernel(%arg0: i32, %arg1: i32, %arg2: memref<16x32xbf16, #tpu.memory_space<vmem>>, %arg3: memref<32x256xbf16, #tpu.memory_space<vmem>>, %arg4: memref<1x256xf32, #tpu.memory_space<vmem>>, %arg5: memref<16x256xf32, #tpu.memory_space<vmem>>) attributes {dimension_semantics = [#tpu.dimension_semantics<parallel>, #tpu.dimension_semantics<parallel>], iteration_bounds = array<i64: 1, 1>, scalar_prefetch = 0 : i64, scratch_operands = 0 : i64, tpu.core_type = #tpu.core_type<tc>, window_params = [{transform_indices = @transform_0, window_bounds = array<i64: 16, 32>}, {transform_indices = @transform_1, window_bounds = array<i64: 32, 256>}, {transform_indices = @transform_2, window_bounds = array<i64: 1, 256>}, {transform_indices = @transform_3, window_bounds = array<i64: 16, 256>}]} {
    %c0 = arith.constant 0 : index
    %c0_0 = arith.constant 0 : index
    %0 = vector.load %arg2[%c0, %c0_0] : memref<16x32xbf16, #tpu.memory_space<vmem>>, vector<16x32xbf16>
    %c0_1 = arith.constant 0 : index
    %c0_2 = arith.constant 0 : index
    %1 = vector.load %arg3[%c0_1, %c0_2] : memref<32x256xbf16, #tpu.memory_space<vmem>>, vector<32x256xbf16>
    %cst = arith.constant dense<0.000000e+00> : vector<16x256xf32>
    %2 = tpu.matmul %0, %1, %cst {dimension_numbers = #tpu.dot_dimension_numbers<[1], [0], [0], [1], [0, 0, 1, 1], [], []>} : vector<16x32xbf16>, vector<32x256xbf16>, vector<16x256xf32> -> vector<16x256xf32>
    %c0_3 = arith.constant 0 : index
    %c0_4 = arith.constant 0 : index
    %3 = vector.load %arg4[%c0_3, %c0_4] : memref<1x256xf32, #tpu.memory_space<vmem>>, vector<1x256xf32>
    %4 = vector.broadcast %3 : vector<1x256xf32> to vector<16x256xf32>
    %5 = arith.addf %2, %4 : vector<16x256xf32>
    %c0_5 = arith.constant 0 : index
    %c0_6 = arith.constant 0 : index
    %6 = vector.load %arg5[%c0_5, %c0_6] : memref<16x256xf32, #tpu.memory_space<vmem>>, vector<16x256xf32>
    tpu.vector_store %arg5[%c0_5, %c0_6], %5 {strides = array<i32>} : memref<16x256xf32, #tpu.memory_space<vmem>>, vector<16x256xf32>,
    return
  }
  func.func @transform_0(%arg0: i32, %arg1: i32) -> (i32, i32) {
    %c0_i32 = arith.constant 0 : i32
    %c0_i32_0 = arith.constant 0 : i32
    return %arg1, %c0_i32 : i32, i32
  }
  func.func @transform_1(%arg0: i32, %arg1: i32) -> (i32, i32) {
    %c0_i32 = arith.constant 0 : i32
    %c0_i32_0 = arith.constant 0 : i32
    return %c0_i32, %arg0 : i32, i32
  }
  func.func @transform_2(%arg0: i32, %arg1: i32) -> (i32, i32) {
    %c0_i32 = arith.constant 0 : i32
    %c0_i32_0 = arith.constant 0 : i32
    return %c0_i32, %arg0 : i32, i32
  }
  func.func @transform_3(%arg0: i32, %arg1: i32) -> (i32, i32) {
    %c0_i32 = arith.constant 0 : i32
    return %arg1, %arg0 : i32, i32
  }
}

</mosaic_0001>

<bundles_post_ra>
// kernel: _unembed_forward.1
= control target key start
LH: loop header
LB: loop body
LE: loop exit
PB: predicated region body
PF: predicated region fallthrough
CT: control target
= control target key end

     0   :  { %8 = vsyncpa [#allocation3], 0  ;;  %s266_s0 = inlined_call_operand.vmem [shape: bf16[16,32], index: 0, kind: input, shape index: {}]   ;;  %s267_s1 = inlined_call_operand.hbm [shape: bf16[32,256], index: 1, kind: input, shape index: {}]   ;;  %s268_s2 = inlined_call_operand.vmem [shape: f32[1,256], index: 2, kind: input, shape index: {}]   ;;  %s269_s3 = inlined_call_operand.hbm [shape: f32[16,256], index: 3, kind: output, shape index: {}]  }
   0x1   :  { %9 = vsyncpa [#allocation4], 0  ;;  %s209_s12 = smov [#allocation2]   ;;  %s161_s16 = scalar_lea.hbm %s267_s1, 512 }
   0x2   :  { %s17_s13 = sshll.u32 %s209_s12, 4  ;;  %p162_p0 = scmp.ne.s32.totalorder %s267_s1, %s161_s16  ;;  %s18_s13 = int_to_ptr.vmem [resolvable:$true] %s17_s13 }
   0x3   :  { %p165_p1 = scmp.lt.u32.totalorder %s161_s16, %s267_s1 }
   0x5   :  { %p167_p2 = pnand %p165_p1, %p162_p0 }
   0x7   :  { %170 = shalt.err (!%p167_p2)
}
   0x8   :  { %s171_s21 = scalar_lea.vmem %s18_s13, 512  ;;  %p176_p4 = scmp.lt.s32.totalorder %s18_s13, %s18_s13 }
   0x9   :  { %p172_p3 = scmp.ne.s32.totalorder %s18_s13, %s171_s21  ;;  %p177_p5 = scmp.lt.s32.totalorder %s171_s21, %s171_s21 }
   0xb   :  { %p178_p6 = por %p177_p5, %p176_p4 }
   0xd   :  { %p179_p7 = pnand %p178_p6, %p172_p3 }
   0xf   :  { %182 = shalt.err (!%p179_p7)
}
  0x10   :  { %s210_s22 = smov 128   ;;  %s211_s23 = smov 8  }
  0x11   :  { %23 = dma.hbm_to_vmem [thread:$0]  %s267_s1, 512, %s18_s13, [#allocation3], %s210_s22, %s210_s22, %s211_s23  }
  0x12   :  { %205 = dma.done.wait [#allocation3], 512  }
  0x13   :  { %206 = vsyncadd [#allocation3], 4294966784  ;;  %v212_v0 = vmov 0   ;;  %v154_v1 = vld [vmem:[#allocation2 + $0x4] ss:$8 sps:$4 sm:$0xff]   ;;  %vm73_vm0 = vcmask 261120   ;;  %v38_v6 = vlaneseq }
  0x14   :  { %109 = vmatprep.mubr.bf16.mxu0 %v212_v0  ;;  %v156_v2 = vld [vmem:[#allocation2] ss:$8 sps:$4 sm:$0xff]   ;;  %77 = vmatprep.subr.bf16.mxu0 %v154_v1  ;;  %v157_v3 = vld [vmem:[#allocation2 + $0x14] ss:$8 sps:$4 sm:$0xff]   ;;  %v159_v4 = vld [vmem:[#allocation2 + $0x10] ss:$8 sps:$4 sm:$0xff]  }
  0x15   :  { %78 = vmatpush1.bf16.msra.mxu0 %v156_v2  ;;  %v160_v5 = vld [vmem:[%s266_s0] sm:$0xff]   ;;  %v39_v7 = vshrl.u32 %v38_v6, 7  ;;  %s213_s29 = smov [#allocation5]  }
  0x16   :  { %79 = vmatprep.subr.bf16.mxu0 %v157_v3  ;;  %v36_v9 = vld [vmem:[%s268_s2] sm:$0x3]  ;;  %s129_s30 = sshll.u32 %s213_s29, 4  ;;  %s130_s30 = int_to_ptr.vmem [resolvable:$true] %s129_s30 }
  0x17   :  { %v40_v8 = vsub.s32 0, %v39_v7  ;;  %v44_v10 = vsub.s32 1, %v39_v7  ;;  %s183_s0 = scalar_lea.vmem %s130_s30, 512  ;;  %p188_p9 = scmp.lt.s32.totalorder %s130_s30, %s130_s30 }
  0x18   :  { %p184_p8 = scmp.ne.s32.totalorder %s130_s30, %s183_s0  ;;  %p189_p10 = scmp.lt.s32.totalorder %s183_s0, %s183_s0 }
  0x19   :  { %80 = vmatpush1.bf16.msra.mxu0 %v159_v4  ;;  %v41_v11 = vrot.slane %v36_v9, %v40_v8  ;;  %v45_v12 = vrot.slane %v36_v9, %v44_v10 }
  0x1a   :  { %p190_p11 = por %p189_p10, %p188_p9 }
  0x1c   :  { %146 = vmatmul.mubr.msk.bf16.vlgmr.msra.gmra.mrb[0].mxu0 %vm73_vm0, %v160_v5  ;;  %p191_p12 = pnand %p190_p11, %p184_p8 }
  0xef   :  { %v111_v13 = vpop.f32.mrb[0].mxu0 }
  0xf0   :  { %v112_v14 = vadd.f32 %v111_v13, %v41_v11  ;;  %v113_v15 = vpop.f32.mrb[1].mxu0 }
  0xf1   :  { %v114_v16 = vadd.f32 %v113_v15, %v45_v12  ;;  %v115_v17 = vpop.f32.mrb[2].mxu0 }
  0xf2   :  { %120 = vst [vmem:[#allocation5] sm:$0xff] %v112_v14  ;;  %v116_v18 = vadd.f32 %v115_v17, %v41_v11  ;;  %v117_v19 = vpop.f32.mrb[3].mxu0 }
  0xf3   :  { %121 = vst [vmem:[#allocation5 + $0x8] sm:$0xff] %v114_v16  ;;  %v118_v20 = vadd.f32 %v117_v19, %v45_v12 }
  0xf4   :  { %122 = vst [vmem:[#allocation5 + $0x10] sm:$0xff] %v116_v18 }
  0xf5   :  { %123 = vst [vmem:[#allocation5 + $0x18] sm:$0xff] %v118_v20 }
  0xf6   :  { %194 = shalt.err (!%p191_p12)
}
  0xf7   :  { %s195_s5 = scalar_lea.hbm %s269_s3, 512 }
  0xf8   :  { %p196_p13 = scmp.ne.s32.totalorder %s269_s3, %s195_s5  ;;  %p199_p0 = scmp.lt.u32.totalorder %s195_s5, %s269_s3 }
  0xfa   :  { %p201_p1 = pnand %p199_p0, %p196_p13 }
  0xfc   :  { %204 = shalt.err (!%p201_p1)
}
  0xfd   :  { %s214_s10 = smov 256   ;;  %s215_s11 = smov 16  }
  0xfe   :  { %135 = dma.vmem_to_hbm [thread:$0]  %s130_s30, 512, %s269_s3, [#allocation4], %s214_s10, %s214_s10, %s215_s11  }
  0xff   :  { %207 = dma.done.wait [#allocation4], 512  }
 0x100   :  { %208 = vsyncadd [#allocation4], 4294966784 }
 0x101   :  { %139 = vsyncpa [#allocation3], 1 }
 0x102   :  { %140 = vsyncpa [#allocation4], 1 }

</bundles_post_ra>
